<compile_context>
chip_gen: v7x
topology: tpu7x:2x2x1
jax: 0.10.0
libtpu: 0.0.40
codegen_flags: <defaults>
</compile_context>

<pallas_src>
import functools

import jax
import jax.numpy as jnp
import numpy as np
from jax import lax
from jax.experimental import pallas as pl
from jax.experimental.pallas import tpu as pltpu

_V_CHUNK = 1024      # vocab rows folded into one one-hot matmul chunk (Path A)
_DMA_DEPTH = 16      # in-flight row DMAs per grid step (Path B)


def _round_up(n, m):
    return ((n + m - 1) // m) * m


def _sublane(dtype):
    # Sublane tile for the dtype: 8 for 4-byte, 16 for 2-byte, 32 for 1-byte.
    return max(8, 32 // max(1, jnp.dtype(dtype).itemsize))


def _pick_tile_n(n, dtype):
    sub = _sublane(dtype)
    return max(sub, min(512, _round_up(n, sub)))


def _vmem_capacity_bytes():
    try:
        return int(pltpu.get_tpu_info().vmem_capacity_bytes)
    except Exception:
        return 64 << 20          # conservative fallback (v7x per-core VMEM)


def _resident_threshold_bytes():
    # Keep the table resident only when 2x its size (double-buffered
    # constant-index input, replicated per core) plus intermediates fits
    # comfortably: 16 MiB on 128 MiB-VMEM parts (v5e/v6e), 6 MiB on v7x.
    return (16 << 20) if _vmem_capacity_bytes() >= (100 << 20) else (6 << 20)


# ---------------------------------------------------------------------------
# Path A: resident table in VMEM, V-chunked one-hot matmul on the MXU.
# ---------------------------------------------------------------------------
def _embed_resident_kernel(ids_ref, table_ref, out_ref, *, v_chunk):
    # ids_ref  : VMEM (TILE_N, 1) int32 token ids for this tile
    # table_ref: VMEM (V, D)      resident across the grid (constant block index)
    # out_ref  : VMEM (TILE_N, D) dense output block
    tile_n, d = out_ref.shape
    v = table_ref.shape[0]
    oh_dtype = (table_ref.dtype
                if jnp.issubdtype(table_ref.dtype, jnp.floating) else jnp.float32)

    idx = ids_ref[...]                                   # (TILE_N, 1)
    acc = jnp.zeros((tile_n, d), jnp.float32)

    num_full = v // v_chunk
    rem = v - num_full * v_chunk

    if num_full > 0:
        # Hoisted base iota: (1, V_chunk), broadcast happens inside the ==.
        col0 = lax.broadcasted_iota(jnp.int32, (1, v_chunk), 1)

        def body(c, acc):
            start = pl.multiple_of(c * v_chunk, v_chunk)
            onehot = (idx == (col0 + c * v_chunk)).astype(oh_dtype)   # (TILE_N, VC)
            chunk = table_ref[pl.ds(start, v_chunk), :]               # (VC, D)
            return acc + jnp.dot(onehot, chunk,
                                 preferred_element_type=jnp.float32)

        acc = lax.fori_loop(0, num_full, body, acc)

    if rem > 0:
        start = num_full * v_chunk                                    # static
        col_r = lax.broadcasted_iota(jnp.int32, (1, rem), 1) + start
        onehot = (idx == col_r).astype(oh_dtype)
        acc = acc + jnp.dot(onehot, table_ref[pl.ds(start, rem), :],
                            preferred_element_type=jnp.float32)

    out_ref[...] = acc.astype(out_ref.dtype)


def _embed_resident(ids, table):
    (n,) = ids.shape
    v, d = table.shape
    tile_n = _pick_tile_n(n, table.dtype)
    n_pad = _round_up(n, tile_n)
    num_tiles = n_pad // tile_n
    ids_pad = jnp.pad(ids, (0, n_pad - n)).reshape(n_pad, 1)

    itemsize = jnp.dtype(table.dtype).itemsize
    vc = min(_V_CHUNK, v)
    cap = _vmem_capacity_bytes()
    # Budget: 2x table (double-buffered constant-index input) + 2x output block
    # + V-chunked one-hot / compare / f32 accumulator intermediates + ids +
    # margin.  V-chunking is what keeps the intermediates bounded independently
    # of vocab size (this was the un-budgeted VMEM consumer before).
    inter = tile_n * vc * (itemsize + 4) + tile_n * d * 4
    vmem_limit = (2 * v * d * itemsize + 2 * tile_n * d * itemsize
                  + 2 * tile_n * 4 + inter + (2 << 20))
    vmem_limit = int(min(max(vmem_limit, 8 << 20), cap // 2))

    cost = pl.CostEstimate(
        flops=int(2 * n_pad * v * d),
        transcendentals=0,
        bytes_accessed=int(v * d * itemsize + n_pad * d * itemsize + n_pad * 4))

    kernel = functools.partial(_embed_resident_kernel, v_chunk=vc)
    out = pl.pallas_call(
        kernel,
        out_shape=jax.ShapeDtypeStruct((n_pad, d), table.dtype),
        grid_spec=pltpu.PrefetchScalarGridSpec(
            num_scalar_prefetch=0,
            grid=(num_tiles,),
            in_specs=[
                pl.BlockSpec((tile_n, 1), lambda i: (i, 0)),
                pl.BlockSpec((v, d), lambda i: (0, 0)),   # resident table, DMA'd once
            ],
            out_specs=pl.BlockSpec((tile_n, d), lambda i: (i, 0)),
        ),
        compiler_params=pltpu.CompilerParams(
            dimension_semantics=("parallel",),            # v7x: 2 TCs split token tiles
            vmem_limit_bytes=vmem_limit,
        ),
        cost_estimate=cost,
    )(ids_pad, table)
    return out[:n]


# ---------------------------------------------------------------------------
# Path B: large vocab -> deep-pipelined manual row DMAs, HBM -> output block.
# ---------------------------------------------------------------------------
def _embed_dma_kernel(ids_ref, table_hbm, out_ref, sems):
    # ids_ref  : SMEM (N_pad + depth,) int32 scalar-prefetched token ids
    # table_hbm: (V, Dw) left in HBM (memory_space=pl.ANY), 32-bit words
    # out_ref  : VMEM (TILE_N, Dw) output block; rows DMA'd straight into it
    # sems     : DMA semaphores, one per in-flight copy slot
    tile_n = out_ref.shape[0]
    depth = min(_DMA_DEPTH, tile_n)
    base = pl.program_id(0) * tile_n

    def issue(r, slot):
        row = ids_ref[base + r]
        pltpu.make_async_copy(
            table_hbm.at[pl.ds(row, 1), :],
            out_ref.at[pl.ds(r, 1), :],
            sems.at[slot],
        ).start()

    # Prime `depth` in-flight row copies (statically unrolled).
    for s in range(depth):
        issue(s, s)

    def body(r, carry):
        slot = r % depth
        # SMEM reads hoisted above the .wait(): the wait breaks sst->sld
        # forwarding, so do every scalar load for this iteration first.
        row_cur = ids_ref[base + r]             # row of the copy in flight in `slot`
        row_nxt = ids_ref[base + r + depth]     # ids padded by `depth`, never OOB
        # Wait using the same descriptor that was issued for this slot
        # (src row `row_cur`, dst row `r`), so the semaphore byte count matches
        # by construction.
        pltpu.make_async_copy(
            table_hbm.at[pl.ds(row_cur, 1), :],
            out_ref.at[pl.ds(r, 1), :],
            sems.at[slot],
        ).wait()

        @pl.when(r + depth < tile_n)
        def _():
            pltpu.make_async_copy(
                table_hbm.at[pl.ds(row_nxt, 1), :],
                out_ref.at[pl.ds(r + depth, 1), :],
                sems.at[slot],
            ).start()

        return carry

    lax.fori_loop(0, tile_n, body, 0, unroll=8)


def _embed_dma(ids, table):
    (n,) = ids.shape
    v, d = table.shape
    orig_dtype = table.dtype
    itemsize = jnp.dtype(orig_dtype).itemsize

    # Gather sub-32-bit tables as packed int32 words so every row DMA is
    # 32-bit aligned inside the packed VMEM output block.
    pack = (4 // itemsize) if (itemsize < 4 and d % (4 // itemsize) == 0) else 1
    if pack > 1:
        table_w = lax.bitcast_convert_type(table.reshape(v, d // pack, pack),
                                           jnp.int32)
    else:
        table_w = table
    dw = table_w.shape[1]
    w_itemsize = jnp.dtype(table_w.dtype).itemsize

    tile_n = _pick_tile_n(n, table_w.dtype)
    n_pad = _round_up(n, tile_n)
    num_tiles = n_pad // tile_n
    depth = min(_DMA_DEPTH, tile_n)
    # Pad with id 0 (valid row): covers (a) token padding up to the tile
    # boundary (sliced off below) and (b) `depth` extra ids so the hoisted
    # next-id SMEM read in the kernel is never out of bounds.
    ids_pad = jnp.pad(ids, (0, n_pad - n + depth))

    cap = _vmem_capacity_bytes()
    vmem_limit = 2 * tile_n * dw * w_itemsize + (4 << 20)
    vmem_limit = int(min(max(vmem_limit, 8 << 20), cap // 2))

    cost = pl.CostEstimate(
        flops=0,
        transcendentals=0,
        bytes_accessed=int(2 * n_pad * dw * w_itemsize + ids_pad.shape[0] * 4))

    out = pl.pallas_call(
        _embed_dma_kernel,
        out_shape=jax.ShapeDtypeStruct((n_pad, dw), table_w.dtype),
        grid_spec=pltpu.PrefetchScalarGridSpec(
            num_scalar_prefetch=1,
            grid=(num_tiles,),
            in_specs=[pl.BlockSpec(memory_space=pl.ANY)],      # table stays in HBM
            out_specs=pl.BlockSpec((tile_n, dw), lambda i, ids: (i, 0)),
            scratch_shapes=[pltpu.SemaphoreType.DMA((_DMA_DEPTH,))],
        ),
        compiler_params=pltpu.CompilerParams(
            dimension_semantics=("parallel",),
            vmem_limit_bytes=vmem_limit,
        ),
        cost_estimate=cost,
    )(ids_pad, table_w)

    if pack > 1:
        out = lax.bitcast_convert_type(out, orig_dtype).reshape(n_pad, d)
    return out[:n]


# ---------------------------------------------------------------------------
# Public wrapper: Pallas equivalent of nn.Embedding(vocab_size, d_model)(x).
# ---------------------------------------------------------------------------
def embedder_forward(x, emb_table, *, force_dma_path=False):
    v, d = emb_table.shape
    orig_shape = x.shape
    # Clamp ids so bad tokens can never drive an out-of-bounds HBM DMA.
    ids = jnp.clip(x.reshape(-1).astype(jnp.int32), 0, v - 1)

    table_bytes = v * d * jnp.dtype(emb_table.dtype).itemsize
    if table_bytes <= _resident_threshold_bytes() and not force_dma_path:
        out = _embed_resident(ids, emb_table)
    else:
        # TODO(synk): when N >> V it can be faster to stream the table in
        # (V_chunk, D) blocks and reuse the one-hot MXU gather instead of
        # per-row DMAs; not implemented here.
        out = _embed_dma(ids, emb_table)
    return out.reshape(*orig_shape, d)


if __name__ == "__main__":
    key = jax.random.PRNGKey(0)

    # --- Test 1: small, module-consistent shapes (f32) -----------------------
    vocab_size, d_model, B, S = 64, 128, 2, 8
    k_emb, k_idx, key = jax.random.split(key, 3)
    emb_table = jax.random.normal(k_emb, (vocab_size, d_model), dtype=jnp.float32)
    x = jax.random.randint(k_idx, (B, S), 0, vocab_size, dtype=jnp.int32)
    ref = jnp.take(emb_table, x, axis=0)

    out = jax.block_until_ready(embedder_forward(x, emb_table))
    assert out.shape == (B, S, d_model)
    assert np.allclose(np.asarray(out), np.asarray(ref)), "resident path mismatch"

    out_dma = jax.block_until_ready(embedder_forward(x, emb_table, force_dma_path=True))
    assert np.allclose(np.asarray(out_dma), np.asarray(ref)), "dma path mismatch"

    # --- Test 2: vocab > one V-chunk -> exercises the chunked one-hot loop
    # (full chunk + remainder chunk) and the DMA path on a larger table.
    vocab2, S2 = 1536, 16
    k_emb2, k_idx2, key = jax.random.split(key, 3)
    emb2 = jax.random.normal(k_emb2, (vocab2, d_model), dtype=jnp.float32)
    x2 = jax.random.randint(k_idx2, (B, S2), 0, vocab2, dtype=jnp.int32)
    ref2 = jnp.take(emb2, x2, axis=0)

    out2 = jax.block_until_ready(embedder_forward(x2, emb2))
    assert np.allclose(np.asarray(out2), np.asarray(ref2)), "chunked resident mismatch"
    out2_dma = jax.block_until_ready(embedder_forward(x2, emb2, force_dma_path=True))
    assert np.allclose(np.asarray(out2_dma), np.asarray(ref2)), "dma path (big V) mismatch"

    # --- Test 3: bf16 table -> dtype-aware sublane tiling, bf16 one-hot on the
    # resident path, and int32-packed row DMAs on the gather path.
    vocab3, S3 = 80, 8
    k_emb3, k_idx3, key = jax.random.split(key, 3)
    emb3 = jax.random.normal(k_emb3, (vocab3, d_model), dtype=jnp.float32).astype(jnp.bfloat16)
    x3 = jax.random.randint(k_idx3, (B, S3), 0, vocab3, dtype=jnp.int32)
    ref3 = jnp.asarray(jnp.take(emb3, x3, axis=0), jnp.float32)

    out3 = jnp.asarray(jax.block_until_ready(embedder_forward(x3, emb3)), jnp.float32)
    assert np.allclose(np.asarray(out3), np.asarray(ref3)), "bf16 resident mismatch"
    out3_dma = jnp.asarray(
        jax.block_until_ready(embedder_forward(x3, emb3, force_dma_path=True)), jnp.float32)
    assert np.allclose(np.asarray(out3_dma), np.asarray(ref3)), "bf16 dma mismatch"

    print("KERNEL_OK")
</pallas_src>

<mosaic_0001>
module attributes {stable_mosaic.version = 11 : i64} {
  func.func @_embed_resident_kernel(%arg0: i32, %arg1: memref<16x1xi32, #tpu.memory_space<vmem>>, %arg2: memref<64x128xf32, #tpu.memory_space<vmem>>, %arg3: memref<16x128xf32, #tpu.memory_space<vmem>>) attributes {dimension_semantics = [#tpu.dimension_semantics<parallel>], iteration_bounds = array<i64: 1>, scalar_prefetch = 0 : i64, scratch_operands = 0 : i64, tpu.core_type = #tpu.core_type<tc>, window_params = [{transform_indices = @transform_0, window_bounds = array<i64: 16, 1>}, {pipeline_mode = #tpu.pipeline_mode<synchronous>, transform_indices = @transform_1, window_bounds = array<i64: 64, 128>}, {transform_indices = @transform_2, window_bounds = array<i64: 16, 128>}]} {
    %c0 = arith.constant 0 : index
    %c0_0 = arith.constant 0 : index
    %0 = vector.load %arg1[%c0, %c0_0] : memref<16x1xi32, #tpu.memory_space<vmem>>, vector<16x1xi32>
    %cst = arith.constant 0.000000e+00 : f32
    %1 = vector.broadcast %cst : f32 to vector<16x128xf32>
    %2 = tpu.iota {dimensions = array<i32: 1>} : vector<1x64xi32>
    %c0_i32 = arith.constant 0 : i32
    %c64_i32 = arith.constant 64 : i32
    %3 = arith.muli %c0_i32, %c64_i32 : i32
    %4 = tpu.assume_multiple %3, 64 : i32
    %c64_i32_1 = arith.constant 64 : i32
    %5 = arith.muli %c0_i32, %c64_i32_1 : i32
    %6 = vector.broadcast %5 : i32 to vector<1x64xi32>
    %7 = arith.addi %2, %6 : vector<1x64xi32>
    %8 = vector.broadcast %0 : vector<16x1xi32> to vector<16x64xi32>
    %9 = vector.broadcast %7 : vector<1x64xi32> to vector<16x64xi32>
    %10 = arith.cmpi eq, %8, %9 : vector<16x64xi32>
    %11 = arith.extui %10 : vector<16x64xi1> to vector<16x64xi32>
    %12 = arith.sitofp %11 : vector<16x64xi32> to vector<16x64xf32>
    %13 = arith.index_cast %4 : i32 to index
    %c0_2 = arith.constant 0 : index
    %14 = vector.load %arg2[%13, %c0_2] : memref<64x128xf32, #tpu.memory_space<vmem>>, vector<64x128xf32>
    %cst_3 = arith.constant dense<0.000000e+00> : vector<16x128xf32>
    %15 = tpu.matmul %12, %14, %cst_3 {dimension_numbers = #tpu.dot_dimension_numbers<[1], [0], [0], [1], [0, 0, 1, 1], [], []>} : vector<16x64xf32>, vector<64x128xf32>, vector<16x128xf32> -> vector<16x128xf32>
    %16 = arith.addf %1, %15 : vector<16x128xf32>
    %c1_i32 = arith.constant 1 : i32
    %c0_4 = arith.constant 0 : index
    %c0_5 = arith.constant 0 : index
    %17 = vector.load %arg3[%c0_4, %c0_5] : memref<16x128xf32, #tpu.memory_space<vmem>>, vector<16x128xf32>
    tpu.vector_store %arg3[%c0_4, %c0_5], %16 {strides = array<i32>} : memref<16x128xf32, #tpu.memory_space<vmem>>, vector<16x128xf32>,
    return
  }
  func.func @transform_0(%arg0: i32) -> (i32, i32) {
    %c0_i32 = arith.constant 0 : i32
    %c0_i32_0 = arith.constant 0 : i32
    return %arg0, %c0_i32 : i32, i32
  }
  func.func @transform_1(%arg0: i32) -> (i32, i32) {
    %c0_i32 = arith.constant 0 : i32
    %c0_i32_0 = arith.constant 0 : i32
    %c0_i32_1 = arith.constant 0 : i32
    return %c0_i32, %c0_i32_0 : i32, i32
  }
  func.func @transform_2(%arg0: i32) -> (i32, i32) {
    %c0_i32 = arith.constant 0 : i32
    %c0_i32_0 = arith.constant 0 : i32
    return %arg0, %c0_i32 : i32, i32
  }
}

</mosaic_0001>

<bundles_post_ra>
// kernel: tpu_custom_call.1
= control target key start
LH: loop header
LB: loop body
LE: loop exit
PB: predicated region body
PF: predicated region fallthrough
CT: control target
= control target key end

     0   :  { %7 = vsyncpa [#allocation3], 0  ;;  %s312_s0 = inlined_call_operand.vmem [shape: s32[16,1], index: 0, kind: input, shape index: {}]   ;;  %s313_s1 = inlined_call_operand.hbm [shape: f32[64,128], index: 1, kind: input, shape index: {}]   ;;  %s314_s2 = inlined_call_operand.hbm [shape: f32[16,128], index: 2, kind: output, shape index: {}]  }
   0x1   :  { %8 = vsyncpa [#allocation4], 0  ;;  %s255_s9 = smov [#allocation2]   ;;  %s207_s13 = scalar_lea.hbm %s313_s1, 1024 }
   0x2   :  { %s16_s10 = sshll.u32 %s255_s9, 4  ;;  %p208_p0 = scmp.ne.s32.totalorder %s313_s1, %s207_s13  ;;  %s17_s10 = int_to_ptr.vmem [resolvable:$true] %s16_s10 }
   0x3   :  { %p211_p1 = scmp.lt.u32.totalorder %s207_s13, %s313_s1 }
   0x5   :  { %p213_p2 = pnand %p211_p1, %p208_p0 }
   0x7   :  { %216 = shalt.err (!%p213_p2)
}
   0x8   :  { %s217_s18 = scalar_lea.vmem %s17_s10, 1024  ;;  %p222_p4 = scmp.lt.s32.totalorder %s17_s10, %s17_s10 }
   0x9   :  { %p218_p3 = scmp.ne.s32.totalorder %s17_s10, %s217_s18  ;;  %p223_p5 = scmp.lt.s32.totalorder %s217_s18, %s217_s18 }
   0xb   :  { %p224_p6 = por %p223_p5, %p222_p4 }
   0xd   :  { %p225_p7 = pnand %p224_p6, %p218_p3 }
   0xf   :  { %228 = shalt.err (!%p225_p7)
}
  0x10   :  { %s256_s19 = smov 128   ;;  %s257_s20 = smov 8  }
  0x11   :  { %22 = dma.hbm_to_vmem [thread:$0]  %s313_s1, 1024, %s17_s10, [#allocation3], %s256_s19, %s256_s19, %s257_s20  }
  0x12   :  { %251 = dma.done.wait [#allocation3], 1024  }
  0x13   :  { %252 = vsyncadd [#allocation3], 4294966272  ;;  %v258_v0 = vmov 0   ;;  %v26_v1 = vld [vmem:[%s312_s0] sm:$0xff]  ;;  %v43_v3 = vld [vmem:[#allocation2 + $0x8] sm:$0xff]  ;;  %v28_v15 = vlaneseq  ;;  %vm50_vm0 = vcmask 523264  }
  0x14   :  { %206 = vset.pattern.permute.xlu0 %v258_v0  ;;  %v42_v2 = vld [vmem:[#allocation2] sm:$0xff]  ;;  %v44_v4 = vld [vmem:[#allocation2 + $0x10] sm:$0xff]  ;;  %v45_v5 = vld [vmem:[#allocation2 + $0x18] sm:$0xff]  ;;  %v259_v18 = vmov 0.0  }
  0x15   :  { %31 = vperm.xlu0 %206, %v26_v1   ;;  %v27_v6 = vld [vmem:[%s312_s0 + $0x8] sm:$0xff]  ;;  %v184_v7 = vpack.c.bf16 %v43_v3, %v42_v2  ;;  %v188_v8 = vpack.c.bf16 %v45_v5, %v44_v4  ;;  %v46_v9 = vld [vmem:[#allocation2 + $0x20] sm:$0xff]  ;;  %v48_v12 = vld [vmem:[#allocation2 + $0x30] sm:$0xff]  ;;  %v29_v16 = vand.u32 127, %v28_v15  ;;  %s260_s0 = smov [#allocation5]  }
  0x16   :  { %v47_v10 = vld [vmem:[#allocation2 + $0x28] sm:$0xff]  ;;  %v49_v13 = vld [vmem:[#allocation2 + $0x38] sm:$0xff]  ;;  %s139_s1 = sshll.u32 %s260_s0, 4  ;;  %s140_s1 = int_to_ptr.vmem [resolvable:$true] %s139_s1 }
  0x17   :  { %185 = vmatprep.subr.bf16.mxu0 %v184_v7  ;;  %v192_v11 = vpack.c.bf16 %v47_v10, %v46_v9  ;;  %v196_v14 = vpack.c.bf16 %v49_v13, %v48_v12  ;;  %s229_s27 = scalar_lea.vmem %s140_s1, 256  ;;  %p234_p9 = scmp.lt.s32.totalorder %s140_s1, %s140_s1 }
  0x18   :  { %187 = vmatpush3.bf16.msra.mxu0 %v184_v7  ;;  %p230_p8 = scmp.ne.s32.totalorder %s140_s1, %s229_s27  ;;  %p235_p10 = scmp.lt.s32.totalorder %s229_s27, %s229_s27 }
  0x19   :  { %34 = vperm.xlu0 %206, %v27_v6   ;;  %189 = vmatprep.subr.bf16.mxu0 %v188_v8 }
  0x1a   :  { %p236_p11 = por %p235_p10, %p234_p9 }
  0x1c   :  { %191 = vmatpush3.bf16.msra.mxu0 %v188_v8  ;;  %p237_p12 = pnand %p236_p11, %p230_p8 }
  0x1d   :  { %193 = vmatprep.subr.bf16.mxu0 %v192_v11 }
  0x20   :  { %195 = vmatpush3.bf16.msra.mxu0 %v192_v11 }
  0x21   :  { %197 = vmatprep.subr.bf16.mxu0 %v196_v14 }
  0x24   :  { %199 = vmatpush3.bf16.msra.mxu0 %v196_v14 }
  0x94   :  { %v32_v17 = vpop.permute.xlu0 %31 }
  0x95   :  { %vm36_vm1 = vcmp.eq.s32.totalorder %v32_v17, %v29_v16 }
  0x96   :  { %v151_v19 = vsel %vm36_vm1, 1.0, %v259_v18 }
  0x97   :  { %181 = vmatprep.mubr.msk.f32.mxu0 %vm50_vm0, %v151_v19 }
  0x98   :  { %v35_v20 = vpop.permute.xlu0 %34 }
  0x99   :  { %vm37_vm2 = vcmp.eq.s32.totalorder %v35_v20, %v29_v16 }
  0x9a   :  { %v152_v21 = vsel %vm37_vm2, 1.0, %v259_v18 }
  0x9b   :  { %182 = vmatmul.mubr.msk.f32.vlgmr.msra.gmra.mrb[0].mxu0 %vm50_vm0, %v152_v21 }
 0x16e   :  { %v183_v22 = vpop.f32.mrb[0].mxu0 }
 0x16f   :  { %133 = vst [vmem:[#allocation5 + $0x8] sm:$0xff] %v183_v22  ;;  %v123_v23 = vpop.f32.mrb[1].mxu0 }
 0x170   :  { %132 = vst [vmem:[#allocation5] sm:$0xff] %v123_v23 }
 0x171   :  { %240 = shalt.err (!%p237_p12)
}
 0x172   :  { %s241_s30 = scalar_lea.hbm %s314_s2, 256 }
 0x173   :  { %p242_p13 = scmp.ne.s32.totalorder %s314_s2, %s241_s30  ;;  %p245_p0 = scmp.lt.u32.totalorder %s241_s30, %s314_s2 }
 0x175   :  { %p247_p1 = pnand %p245_p0, %p242_p13 }
 0x177   :  { %250 = shalt.err (!%p247_p1)
}
 0x178   :  { %145 = dma.vmem_to_hbm [thread:$0]  %s140_s1, 256, %s314_s2, [#allocation4], %s256_s19, %s256_s19, %s257_s20  }
 0x179   :  { %253 = dma.done.wait [#allocation4], 256  }
 0x17a   :  { %254 = vsyncadd [#allocation4], 4294967040 }
 0x17b   :  { %149 = vsyncpa [#allocation3], 1 }
 0x17c   :  { %150 = vsyncpa [#allocation4], 1 }

</bundles_post_ra>
